<compile_context>
chip_gen: v5e
topology: v5e:2x2
jax: 0.10.0
libtpu: 0.0.40
codegen_flags: <defaults>
</compile_context>

<pallas_src>
import functools

import jax
import jax.numpy as jnp
from jax.experimental import pallas as pl
from jax.experimental.pallas import tpu as pltpu


def _round_up(v: int, m: int) -> int:
    return (v + m - 1) // m * m


def _vmem_budget_bytes() -> int:
    """Per-generation VMEM budget: ~75% of physical (96 MiB v5e/v6e, 48 MiB v7x)."""
    try:
        cap = int(pltpu.get_tpu_info().vmem_capacity_bytes)
    except Exception:
        cap = 64 * 1024 * 1024  # conservative (v7x-sized) fallback
    return (cap * 3) // 4


def _resident_spec(block_shape, index_map):
    """BlockSpec for an operand with a constant index_map: resident in VMEM,
    single-buffered (double-buffering a never-changing block is pure VMEM waste)."""
    try:
        return pl.BlockSpec(block_shape, index_map, pipeline_mode=pl.Buffered(1))
    except (AttributeError, TypeError):  # older jax: fall back to default buffering
        return pl.BlockSpec(block_shape, index_map)


# ----------------------------- kernels --------------------------------------


def _fused_kernel(x_ref, w1_ref, b1_ref, w2_ref, b2_ref, o_ref, *, use_bf16):
    """Whole reduction dim resident: fc2(relu(fc1(x))) for one batch tile."""
    x = x_ref[...]
    if use_bf16:
        x = x.astype(jnp.bfloat16)  # no-op if x was already cast at pad time
    h = jnp.dot(x, w1_ref[...], preferred_element_type=jnp.float32)
    h = jnp.maximum(h + b1_ref[...], 0.0)  # bias + ReLU in f32 (VPU-safe on v5e)
    if use_bf16:
        h = h.astype(jnp.bfloat16)
    out = jnp.dot(h, w2_ref[...], preferred_element_type=jnp.float32)
    o_ref[...] = (out + b2_ref[...]).astype(o_ref.dtype)


def _ktiled_kernel(x_ref, w1_ref, b1_ref, w2_ref, b2_ref, o_ref, h_acc, *, use_bf16):
    """fc1 K-tiled over the input dim; f32 accumulator in VMEM scratch."""
    k = pl.program_id(1)

    @pl.when(k == 0)
    def _init():
        h_acc[...] = jnp.zeros_like(h_acc)

    x = x_ref[...]
    if use_bf16:
        x = x.astype(jnp.bfloat16)
    h_acc[...] += jnp.dot(x, w1_ref[...], preferred_element_type=jnp.float32)

    @pl.when(k == pl.num_programs(1) - 1)
    def _finalize():
        h = jnp.maximum(h_acc[...] + b1_ref[...], 0.0)
        if use_bf16:
            h = h.astype(jnp.bfloat16)
        out = jnp.dot(h, w2_ref[...], preferred_element_type=jnp.float32)
        o_ref[...] = (out + b2_ref[...]).astype(o_ref.dtype)


# ----------------------------- wrapper ---------------------------------------


def prepare_params(w1, b1, w2, b2, *, use_bf16=True):
    """One-time padding (+ optional bf16 cast) of the weights.

    Call once at init time, NOT per forward call.  Feature dims are padded to
    multiples of 128 so every kernel load/store is lane-dense and both matmuls
    feed full MXU tiles; zero padding keeps the math exact.  Biases stay f32.
    Weights are stored transposed, i.e. (in, out).
    """
    D, H = w1.shape
    C = w2.shape[1]
    Dp, Hp, Cp = _round_up(D, 128), _round_up(H, 128), _round_up(C, 128)
    w1p = jnp.pad(w1, ((0, Dp - D), (0, Hp - H)))
    w2p = jnp.pad(w2, ((0, Hp - H), (0, Cp - C)))
    b1p = jnp.pad(jnp.reshape(b1, (1, H)).astype(jnp.float32), ((0, 0), (0, Hp - H)))
    b2p = jnp.pad(jnp.reshape(b2, (1, C)).astype(jnp.float32), ((0, 0), (0, Cp - C)))
    if use_bf16:
        w1p = w1p.astype(jnp.bfloat16)
        w2p = w2p.astype(jnp.bfloat16)
    return w1p, b1p, w2p, b2p


@functools.partial(jax.jit, static_argnames=("num_classes", "block_b", "k_block"))
def classifier_forward(x, w1p, b1p, w2p, b2p, *, num_classes=None,
                       block_b=512, k_block=None):
    """Pallas forward pass: fc2(relu(fc1(x))).

    x:   (B, D)   float32 (unpadded)
    w1p: (Dp, Hp) padded fc1 weight (in, out), f32 or bf16 (see prepare_params)
    b1p: (1, Hp)  f32
    w2p: (Hp, Cp) padded fc2 weight (in, out)
    b2p: (1, Cp)  f32
    returns (B, num_classes) float32 (num_classes defaults to Cp)
    """
    B, D = x.shape
    Dp, Hp = w1p.shape
    Cp = w2p.shape[1]
    use_bf16 = w1p.dtype == jnp.bfloat16
    wbytes = w1p.dtype.itemsize

    budget = _vmem_budget_bytes()

    # ---- choose K tiling over the fc1 reduction dim -------------------------
    resident_w_bytes = (Dp * Hp + Hp * Cp) * wbytes + (Hp + Cp) * 4
    if k_block is not None:
        tk = int(k_block)
    elif resident_w_bytes > (budget * 3) // 5:
        # Weights would hog VMEM (v7x-sized models): stream fc1's K-blocks.
        tk = max(d for d in (512, 256, 128) if Dp % d == 0)
    else:
        tk = Dp
    assert Dp % tk == 0 and tk % 128 == 0, "k_block must be a 128-multiple dividing Dp"
    nk = Dp // tk
    # TODO(synk): also tile Hp (fc2 weight / hidden accumulator) if Hp*Cp alone
    # ever exceeds the VMEM budget.

    # ---- feature-dim pad of x only when needed; fold bf16 cast into the pad --
    if Dp != D:
        xp = jnp.pad(x, ((0, 0), (0, Dp - D)))
        if use_bf16:
            xp = xp.astype(jnp.bfloat16)  # fused with the pad, not a separate HBM pass
    else:
        xp = x  # cast happens in-kernel, hidden under MXU work
    x_bytes = xp.dtype.itemsize

    # ---- choose batch tile (multiple of 16; multiple of 256 for large B) -----
    block_b = _round_up(max(int(block_b), 16), 16)

    def vmem_need(tb):
        need = (1 if nk == 1 else 2) * tk * Hp * wbytes   # fc1 weight block(s)
        need += Hp * Cp * wbytes + (Hp + Cp) * 4          # fc2 weight + biases (1 buffer)
        need += 2 * tb * tk * x_bytes                     # x tiles (double-buffered)
        need += 2 * tb * Cp * 4                           # out tiles (double-buffered)
        need += tb * Hp * 4                               # hidden activations / accumulator
        return need

    TB = B if B <= block_b else block_b                   # TB == B is always layout-legal
    while TB > 16 and vmem_need(TB) > budget:
        TB = max(16, _round_up(TB // 2, 16))
    nb = pl.cdiv(B, TB)

    cost = pl.CostEstimate(
        flops=2 * B * (Dp * Hp + Hp * Cp),
        transcendentals=0,
        bytes_accessed=(B * Dp * x_bytes + (Dp * Hp + Hp * Cp) * wbytes
                        + (Hp + Cp) * 4 + B * Cp * 4),
    )

    out_shape = jax.ShapeDtypeStruct((B, Cp), jnp.float32)

    if nk == 1:
        kernel = functools.partial(_fused_kernel, use_bf16=use_bf16)
        out = pl.pallas_call(
            kernel,
            out_shape=out_shape,
            grid=(nb,),
            in_specs=[
                pl.BlockSpec((TB, Dp), lambda i: (i, 0)),        # x streamed over batch
                _resident_spec((Dp, Hp), lambda i: (0, 0)),      # W1 resident, 1 buffer
                _resident_spec((1, Hp), lambda i: (0, 0)),       # b1 resident
                _resident_spec((Hp, Cp), lambda i: (0, 0)),      # W2 resident
                _resident_spec((1, Cp), lambda i: (0, 0)),       # b2 resident
            ],
            out_specs=pl.BlockSpec((TB, Cp), lambda i: (i, 0)),
            compiler_params=pltpu.CompilerParams(
                dimension_semantics=("parallel",),               # TC-sharded on v7x
                vmem_limit_bytes=budget,
            ),
            cost_estimate=cost,
        )(xp, w1p, b1p, w2p, b2p)
    else:
        kernel = functools.partial(_ktiled_kernel, use_bf16=use_bf16)
        out = pl.pallas_call(
            kernel,
            out_shape=out_shape,
            grid=(nb, nk),
            in_specs=[
                pl.BlockSpec((TB, tk), lambda i, k: (i, k)),     # x batch x K stream
                pl.BlockSpec((tk, Hp), lambda i, k: (k, 0)),     # W1 K-blocks, pipelined
                _resident_spec((1, Hp), lambda i, k: (0, 0)),    # b1 resident
                _resident_spec((Hp, Cp), lambda i, k: (0, 0)),   # W2 resident
                _resident_spec((1, Cp), lambda i, k: (0, 0)),    # b2 resident
            ],
            out_specs=pl.BlockSpec((TB, Cp), lambda i, k: (i, 0)),
            scratch_shapes=[pltpu.VMEM((TB, Hp), jnp.float32)],
            compiler_params=pltpu.CompilerParams(
                dimension_semantics=("parallel", "arbitrary"),
                vmem_limit_bytes=budget,
            ),
            cost_estimate=cost,
        )(xp, w1p, b1p, w2p, b2p)

    if num_classes is not None and num_classes != Cp:
        out = out[:, :num_classes]
    return out


# ----------------------------- test harness ----------------------------------


def init_params(key, input_dim, hidden_dim, num_classes):
    """PyTorch nn.Linear-style init; weights stored transposed as (in, out)."""
    k1, k2, k3, k4 = jax.random.split(key, 4)
    bound1 = 1.0 / (input_dim ** 0.5)
    bound2 = 1.0 / (hidden_dim ** 0.5)
    w1 = jax.random.uniform(k1, (input_dim, hidden_dim), jnp.float32, -bound1, bound1)
    b1 = jax.random.uniform(k2, (1, hidden_dim), jnp.float32, -bound1, bound1)
    w2 = jax.random.uniform(k3, (hidden_dim, num_classes), jnp.float32, -bound2, bound2)
    b2 = jax.random.uniform(k4, (1, num_classes), jnp.float32, -bound2, bound2)
    return w1, b1, w2, b2


def _reference(x, w1, b1, w2, b2):
    hi = jax.lax.Precision.HIGHEST
    h = jnp.maximum(jnp.dot(x, w1, precision=hi) + b1, 0.0)
    return jnp.dot(h, w2, precision=hi) + b2


if __name__ == "__main__":
    # Shapes consistent with the PyTorch Classifier.
    INPUT_DIM, HIDDEN_DIM, NUM_CLASSES, BATCH = 16, 32, 8, 4

    key = jax.random.PRNGKey(0)
    kx, kp, kx2, kp2 = jax.random.split(key, 4)
    x = jax.random.normal(kx, (BATCH, INPUT_DIM), jnp.float32)
    w1, b1, w2, b2 = init_params(kp, INPUT_DIM, HIDDEN_DIM, NUM_CLASSES)
    ref = _reference(x, w1, b1, w2, b2)

    # 1) Default path: bf16 MXU operands (f32 accumulation), fused kernel.
    p_bf16 = prepare_params(w1, b1, w2, b2, use_bf16=True)
    out_bf16 = jax.block_until_ready(
        classifier_forward(x, *p_bf16, num_classes=NUM_CLASSES))
    assert out_bf16.shape == (BATCH, NUM_CLASSES)
    assert jnp.allclose(out_bf16, ref, atol=2e-2, rtol=2e-2)

    # 2) f32-operand path.
    p_f32 = prepare_params(w1, b1, w2, b2, use_bf16=False)
    out_f32 = jax.block_until_ready(
        classifier_forward(x, *p_f32, num_classes=NUM_CLASSES))
    assert out_f32.shape == (BATCH, NUM_CLASSES)
    assert jnp.allclose(out_f32, ref, atol=2e-3, rtol=2e-3)

    # 3) Exercise the K-tiled (large-model / v7x) path with a forced k_block.
    D2, H2, C2, B2 = 384, 64, 10, 16
    x2 = jax.random.normal(kx2, (B2, D2), jnp.float32)
    w1b, b1b, w2b, b2b = init_params(kp2, D2, H2, C2)
    ref2 = _reference(x2, w1b, b1b, w2b, b2b)
    p2 = prepare_params(w1b, b1b, w2b, b2b, use_bf16=False)
    out2 = jax.block_until_ready(
        classifier_forward(x2, *p2, num_classes=C2, k_block=128))
    assert out2.shape == (B2, C2)
    assert jnp.allclose(out2, ref2, atol=2e-3, rtol=2e-3)

    print("KERNEL_OK")
</pallas_src>

<mosaic_0001>
module attributes {stable_mosaic.version = 11 : i64} {
  func.func @_fused_kernel(%arg0: i32, %arg1: memref<4x128xbf16, #tpu.memory_space<vmem>>, %arg2: memref<128x128xbf16, #tpu.memory_space<vmem>>, %arg3: memref<1x128xf32, #tpu.memory_space<vmem>>, %arg4: memref<128x128xbf16, #tpu.memory_space<vmem>>, %arg5: memref<1x128xf32, #tpu.memory_space<vmem>>, %arg6: memref<4x128xf32, #tpu.memory_space<vmem>>) attributes {dimension_semantics = [#tpu.dimension_semantics<parallel>], iteration_bounds = array<i64: 1>, scalar_prefetch = 0 : i64, scratch_operands = 0 : i64, tpu.core_type = #tpu.core_type<tc>, window_params = [{transform_indices = @transform_0, window_bounds = array<i64: 4, 128>}, {pipeline_mode = #tpu.pipeline_mode<synchronous>, transform_indices = @transform_1, window_bounds = array<i64: 128, 128>}, {pipeline_mode = #tpu.pipeline_mode<synchronous>, transform_indices = @transform_2, window_bounds = array<i64: 1, 128>}, {pipeline_mode = #tpu.pipeline_mode<synchronous>, transform_indices = @transform_3, window_bounds = array<i64: 128, 128>}, {pipeline_mode = #tpu.pipeline_mode<synchronous>, transform_indices = @transform_4, window_bounds = array<i64: 1, 128>}, {transform_indices = @transform_5, window_bounds = array<i64: 4, 128>}]} {
    %c0 = arith.constant 0 : index
    %c0_0 = arith.constant 0 : index
    %0 = vector.load %arg1[%c0, %c0_0] : memref<4x128xbf16, #tpu.memory_space<vmem>>, vector<4x128xbf16>
    %c0_1 = arith.constant 0 : index
    %c0_2 = arith.constant 0 : index
    %1 = vector.load %arg2[%c0_1, %c0_2] : memref<128x128xbf16, #tpu.memory_space<vmem>>, vector<128x128xbf16>
    %cst = arith.constant dense<0.000000e+00> : vector<4x128xf32>
    %2 = tpu.matmul %0, %1, %cst {dimension_numbers = #tpu.dot_dimension_numbers<[1], [0], [0], [1], [0, 0, 1, 1], [], []>} : vector<4x128xbf16>, vector<128x128xbf16>, vector<4x128xf32> -> vector<4x128xf32>
    %c0_3 = arith.constant 0 : index
    %c0_4 = arith.constant 0 : index
    %3 = vector.load %arg3[%c0_3, %c0_4] : memref<1x128xf32, #tpu.memory_space<vmem>>, vector<1x128xf32>
    %4 = vector.broadcast %3 : vector<1x128xf32> to vector<4x128xf32>
    %5 = arith.addf %2, %4 : vector<4x128xf32>
    %cst_5 = arith.constant 0.000000e+00 : f32
    %6 = vector.broadcast %cst_5 : f32 to vector<4x128xf32>
    %7 = arith.maximumf %5, %6 : vector<4x128xf32>
    %8 = arith.truncf %7 : vector<4x128xf32> to vector<4x128xbf16>
    %c0_6 = arith.constant 0 : index
    %c0_7 = arith.constant 0 : index
    %9 = vector.load %arg4[%c0_6, %c0_7] : memref<128x128xbf16, #tpu.memory_space<vmem>>, vector<128x128xbf16>
    %cst_8 = arith.constant dense<0.000000e+00> : vector<4x128xf32>
    %10 = tpu.matmul %8, %9, %cst_8 {dimension_numbers = #tpu.dot_dimension_numbers<[1], [0], [0], [1], [0, 0, 1, 1], [], []>} : vector<4x128xbf16>, vector<128x128xbf16>, vector<4x128xf32> -> vector<4x128xf32>
    %c0_9 = arith.constant 0 : index
    %c0_10 = arith.constant 0 : index
    %11 = vector.load %arg5[%c0_9, %c0_10] : memref<1x128xf32, #tpu.memory_space<vmem>>, vector<1x128xf32>
    %12 = vector.broadcast %11 : vector<1x128xf32> to vector<4x128xf32>
    %13 = arith.addf %10, %12 : vector<4x128xf32>
    %c0_11 = arith.constant 0 : index
    %c0_12 = arith.constant 0 : index
    %14 = vector.load %arg6[%c0_11, %c0_12] : memref<4x128xf32, #tpu.memory_space<vmem>>, vector<4x128xf32>
    tpu.vector_store %arg6[%c0_11, %c0_12], %13 {strides = array<i32>} : memref<4x128xf32, #tpu.memory_space<vmem>>, vector<4x128xf32>,
    return
  }
  func.func @transform_0(%arg0: i32) -> (i32, i32) {
    %c0_i32 = arith.constant 0 : i32
    %c0_i32_0 = arith.constant 0 : i32
    return %arg0, %c0_i32 : i32, i32
  }
  func.func @transform_1(%arg0: i32) -> (i32, i32) {
    %c0_i32 = arith.constant 0 : i32
    %c0_i32_0 = arith.constant 0 : i32
    %c0_i32_1 = arith.constant 0 : i32
    return %c0_i32, %c0_i32_0 : i32, i32
  }
  func.func @transform_2(%arg0: i32) -> (i32, i32) {
    %c0_i32 = arith.constant 0 : i32
    %c0_i32_0 = arith.constant 0 : i32
    %c0_i32_1 = arith.constant 0 : i32
    return %c0_i32, %c0_i32_0 : i32, i32
  }
  func.func @transform_3(%arg0: i32) -> (i32, i32) {
    %c0_i32 = arith.constant 0 : i32
    %c0_i32_0 = arith.constant 0 : i32
    %c0_i32_1 = arith.constant 0 : i32
    return %c0_i32, %c0_i32_0 : i32, i32
  }
  func.func @transform_4(%arg0: i32) -> (i32, i32) {
    %c0_i32 = arith.constant 0 : i32
    %c0_i32_0 = arith.constant 0 : i32
    %c0_i32_1 = arith.constant 0 : i32
    return %c0_i32, %c0_i32_0 : i32, i32
  }
  func.func @transform_5(%arg0: i32) -> (i32, i32) {
    %c0_i32 = arith.constant 0 : i32
    %c0_i32_0 = arith.constant 0 : i32
    return %arg0, %c0_i32 : i32, i32
  }
}

</mosaic_0001>

<bundles_post_ra>
// kernel: classifier_forward.1
= control target key start
LH: loop header
LB: loop body
LE: loop exit
PB: predicated region body
PF: predicated region fallthrough
CT: control target
= control target key end

     0   :  { %10 = vsyncpa [#allocation3], 0  ;;  %s455_s0 = inlined_call_operand.vmem [shape: bf16[4,128], index: 0, kind: input, shape index: {}]   ;;  %s456_s1 = inlined_call_operand.hbm [shape: bf16[128,128], index: 1, kind: input, shape index: {}]   ;;  %s457_s2 = inlined_call_operand.vmem [shape: f32[1,128], index: 2, kind: input, shape index: {}]   ;;  %s458_s3 = inlined_call_operand.hbm [shape: bf16[128,128], index: 3, kind: input, shape index: {}]   ;;  %s459_s4 = inlined_call_operand.vmem [shape: f32[1,128], index: 4, kind: input, shape index: {}]   ;;  %s460_s5 = inlined_call_operand.hbm [shape: f32[4,128], index: 5, kind: output, shape index: {}]  }
   0x1   :  { %11 = vsyncpa [#allocation6], 0 }
   0x2   :  { %12 = vsyncpa [#allocation4], 0  ;;  %s19_s20 = sshll.u32 %s456_s1, 4  ;;  %s402_s21 = smov [#allocation2]   ;;  %s20_s20 = int_to_ptr.hbm [resolvable:$true] %s19_s20 }
   0x3   :  { %s21_s22 = sshll.u32 %s402_s21, 4  ;;  %s34_s25 = sshll.u32 %s458_s3, 4  ;;  %s22_s22 = int_to_ptr.vmem [resolvable:$true] %s21_s22  ;;  %s35_s25 = int_to_ptr.hbm [resolvable:$true] %s34_s25 }
   0x4   :  { %s403_s26 = smov 64   ;;  %s404_s27 = smov 4  }
   0x5   :  { %27 = dma.hbm_to_vmem [thread:$0]  %s20_s20, 1024, %s22_s22, [#allocation3], %s403_s26, %s403_s26, %s404_s27  }
   0x6   :  { %s405_s28 = smov [#allocation5]  }
   0x7   :  { %s36_s29 = sshll.u32 %s405_s28, 4  ;;  %s37_s29 = int_to_ptr.vmem [resolvable:$true] %s36_s29 }
   0x8   :  { %42 = dma.hbm_to_vmem [thread:$0]  %s35_s25, 1024, %s37_s29, [#allocation6], %s403_s26, %s403_s26, %s404_s27  }
   0x9   :  { %396 = dma.done.wait [#allocation3], 1024  }
   0xa   :  { %397 = vsyncadd [#allocation3], 4294966272 }
   0xb   :  { %398 = dma.done.wait [#allocation6], 1024  }
   0xc   :  { %399 = vsyncadd [#allocation6], 4294966272  ;;  %v308_v0 = vld [vmem:[#allocation2 + $0x38] sm:$0xff]  ;;  %v307_v1 = vld [vmem:[#allocation2 + $0x30] sm:$0xff]  ;;  %s226_s12 = sshll.u32 %s460_s5, 4  ;;  %s227_s12 = int_to_ptr.hbm [resolvable:$true] %s226_s12 }
   0xd   :  { %122 = vmatpush.bf16.msra.mxu0 %v308_v0  ;;  %v316_v2 = vld [vmem:[#allocation5 + $0x38] sm:$0xff]  ;;  %v315_v3 = vld [vmem:[#allocation5 + $0x30] sm:$0xff]  ;;  %v306_v4 = vld [vmem:[#allocation2 + $0x28] sm:$0xff] }
   0xe   :  { %205 = vmatpush.bf16.msra.mxu1 %v316_v2  ;;  %v314_v5 = vld [vmem:[#allocation5 + $0x28] sm:$0xff]  ;;  %v305_v6 = vld [vmem:[#allocation2 + $0x20] sm:$0xff]  ;;  %v304_v8 = vld [vmem:[#allocation2 + $0x18] sm:$0xff] }
   0xf   :  { %v313_v7 = vld [vmem:[#allocation5 + $0x20] sm:$0xff]  ;;  %v312_v9 = vld [vmem:[#allocation5 + $0x18] sm:$0xff]  ;;  %v303_v10 = vld [vmem:[#allocation2 + $0x10] sm:$0xff] }
  0x10   :  { %v311_v11 = vld [vmem:[#allocation5 + $0x10] sm:$0xff]  ;;  %v302_v12 = vld [vmem:[#allocation2 + $0x8] sm:$0xff]  ;;  %v301_v13 = vld [vmem:[#allocation2] sm:$0xff] }
  0x11   :  { %123 = vmatpush.bf16.msra.mxu0 %v307_v1  ;;  %v53_v14 = vld [vmem:[%s455_s0] sm:$0x3]  ;;  %v310_v15 = vld [vmem:[#allocation5 + $0x8] sm:$0xff]  ;;  %s406_s0 = smov [#allocation7]  }
  0x12   :  { %206 = vmatpush.bf16.msra.mxu1 %v315_v3  ;;  %v309_v16 = vld [vmem:[#allocation5] sm:$0xff]  ;;  %s224_s9 = sshll.u32 %s406_s0, 4  ;;  %s225_s9 = int_to_ptr.vmem [resolvable:$true] %s224_s9 }
  0x13   :  { %v322_v17 = vld [vmem:[%s457_s2] ss:$0 sm:$0xff] }
  0x14   :  { %v323_v23 = vld [vmem:[%s459_s4] ss:$0 sm:$0xff] }
  0x15   :  { %124 = vmatpush.bf16.msra.mxu0 %v306_v4 }
  0x16   :  { %207 = vmatpush.bf16.msra.mxu1 %v314_v5 }
  0x19   :  { %125 = vmatpush.bf16.msra.mxu0 %v305_v6 }
  0x1a   :  { %208 = vmatpush.bf16.msra.mxu1 %v313_v7 }
  0x1d   :  { %126 = vmatpush.bf16.msra.mxu0 %v304_v8 }
  0x1e   :  { %209 = vmatpush.bf16.msra.mxu1 %v312_v9 }
  0x21   :  { %127 = vmatpush.bf16.msra.mxu0 %v303_v10 }
  0x22   :  { %210 = vmatpush.bf16.msra.mxu1 %v311_v11 }
  0x25   :  { %128 = vmatpush.bf16.msra.mxu0 %v302_v12 }
  0x26   :  { %211 = vmatpush.bf16.msra.mxu1 %v310_v15 }
  0x29   :  { %129 = vmatpush.bf16.msra.mxu0 %v301_v13 }
  0x2a   :  { %212 = vmatpush.bf16.msra.mxu1 %v309_v16 }
  0x2c   :  { %130 = vmatmul.bf16.vlgmr.msra.gmra.mxu0 %v53_v14 }
  0xa9   :  { %v131_v18 = vpop.f32.mrf.mxu0 }
  0xaa   :  { %v132_v19 = vadd.f32 %v322_v17, %v131_v18 }
  0xac   :  { %v135_v20 = vmax.f32 %v132_v19, 0.0 }
  0xae   :  { %v136_v21 = vpack.c.bf16 %v135_v20, %v135_v20 }
  0xb0   :  { %213 = vmatmul.bf16.vlgmr.msra.gmra.mxu1 %v136_v21 }
  0xb1   :  { %v133_v22 = vpop.f32.mrf.mxu0 }
 0x12d   :  { %v214_v24 = vpop.f32.mrf.mxu1 }
 0x12e   :  { %v215_v25 = vadd.f32 %v323_v23, %v214_v24 }
 0x130   :  { %218 = vst [vmem:[#allocation7] sm:$0xf] %v215_v25 }
 0x131   :  { %229 = dma.vmem_to_hbm [thread:$0]  %s225_s9, 64, %s227_s12, [#allocation4]  }
 0x135   :  { %v216_v26 = vpop.f32.mrf.mxu1 }
 0x136   :  { %400 = dma.done.wait [#allocation4], 64  }
 0x137   :  { %401 = vsyncadd [#allocation4], 4294967232 }
 0x138   :  { %234 = vsyncpa [#allocation3], 1 }
 0x139   :  { %235 = vsyncpa [#allocation6], 1 }
 0x13a   :  { %236 = vsyncpa [#allocation4], 1 }

</bundles_post_ra>
